<compile_context>
chip_gen: v7x
topology: tpu7x:2x2x1
jax: 0.10.0
libtpu: 0.0.40
codegen_flags: <defaults>
</compile_context>

<pallas_src>
import math
import functools

import numpy as np
import jax
import jax.numpy as jnp
from jax.experimental import pallas as pl
from jax.experimental.pallas import tpu as pltpu

BBOX_XFORM_CLIP = math.log(1000.0 / 16.0)
LANE = 128


def _round_up(x, m):
    return ((x + m - 1) // m) * m


def _vmem_limit_bytes(block_nbytes, floor=16 << 20, ceil=48 << 20):
    """Explicit scoped-VMEM budget: 2x (double buffers) + headroom, clamped."""
    est = 2 * int(sum(block_nbytes)) + (4 << 20)
    return int(min(max(est, floor), ceil))


# ----------------------------------------------------------------------------
# Pallas kernels
# ----------------------------------------------------------------------------
def _roi_align_kernel(bidx_ref, wy_ref, wx_ref, feat_ref, out_ref, *, P, W, C):
    """Separable bilinear RoIAlign for one ROI.

    wy: (P, H) f32 bin weights over rows, wx: (P, W) over cols,
    feat: (H, W*C) f32 slab of the ROI's image (selected via scalar prefetch).
    out: (P*P, C) bf16, rows ordered (py, px).
    """
    wy = wy_ref[0]                                     # (P, H)
    wx = wx_ref[0]                                     # (P, W)
    feat = feat_ref[0]                                 # (H, W*C)
    s1 = jnp.dot(wy, feat, preferred_element_type=jnp.float32)   # (P, W*C)
    s1 = s1.reshape(P, W, C)
    rows = []
    for py in range(P):                                # static unroll, P is small
        rows.append(jnp.dot(wx, s1[py], preferred_element_type=jnp.float32))  # (P, C)
    out_ref[0] = jnp.concatenate(rows, axis=0).astype(out_ref.dtype)


def _box_head_kernel(x_ref, w6_ref, b6_ref, w7_ref, b7_ref, wp_ref, bp_ref,
                     props_ref, out_ref, *, seg, box_weights):
    """Fused TwoMLPHead + (cls||bbox) predictor + softmax + BoxCoder.decode.

    Output layout, every segment 128-lane aligned (seg = round_up(K, 128)):
      [:, 0*seg:1*seg]  softmax scores (cols >= K are exactly 0)
      [:, 1*seg:2*seg]  x1 per class
      [:, 2*seg:3*seg]  y1 per class
      [:, 3*seg:4*seg]  x2 per class
      [:, 4*seg:5*seg]  y2 per class
    """
    wxw, wyw, www, whw = box_weights

    x = x_ref[...]                                                   # (TR, Kin) bf16
    h = jnp.dot(x, w6_ref[...], preferred_element_type=jnp.float32) + b6_ref[...]
    h = jnp.maximum(h, 0.0)
    h = jnp.dot(h.astype(jnp.bfloat16), w7_ref[...],
                preferred_element_type=jnp.float32) + b7_ref[...]
    h = jnp.maximum(h, 0.0)

    # one full-width MXU pass for cls + bbox (padded, coordinate-major segments)
    pred = jnp.dot(h.astype(jnp.bfloat16), wp_ref[...],
                   preferred_element_type=jnp.float32) + bp_ref[...]  # (TR, 5*seg)

    # softmax over the first segment; padding logits carry a -1e9 bias -> exp==0
    logits = pred[:, 0:seg]
    m = jnp.max(logits, axis=-1, keepdims=True)
    e = jnp.exp(logits - m)
    s = jnp.sum(e, axis=-1, keepdims=True)
    scores = e / s                                    # exact division (review note)

    props = props_ref[...]                            # (TR, 4) f32
    widths = props[:, 2:3] - props[:, 0:1]
    heights = props[:, 3:4] - props[:, 1:2]
    ctr_x = props[:, 0:1] + 0.5 * widths
    ctr_y = props[:, 1:2] + 0.5 * heights

    dx = pred[:, 1 * seg:2 * seg] * (1.0 / wxw)
    dy = pred[:, 2 * seg:3 * seg] * (1.0 / wyw)
    dw = jnp.minimum(pred[:, 3 * seg:4 * seg] * (1.0 / www), BBOX_XFORM_CLIP)
    dh = jnp.minimum(pred[:, 4 * seg:5 * seg] * (1.0 / whw), BBOX_XFORM_CLIP)

    pred_ctr_x = dx * widths + ctr_x
    pred_ctr_y = dy * heights + ctr_y
    pred_w = jnp.exp(dw) * widths
    pred_h = jnp.exp(dh) * heights

    x1 = pred_ctr_x - 0.5 * pred_w
    y1 = pred_ctr_y - 0.5 * pred_h
    x2 = pred_ctr_x + 0.5 * pred_w
    y2 = pred_ctr_y + 0.5 * pred_h

    # all parts are 128-wide segments -> single unmasked lane-dense store
    out_ref[...] = jnp.concatenate([scores, x1, y1, x2, y2], axis=-1)


def _mask_head_kernel(labels_ref, x_ref, w1_ref, b1_ref, w2_ref, b2_ref,
                      wp_ref, bp_ref, o_ref):
    """Fused mask head (1x1 convs as matmuls) + predictor + per-detection class
    selection (scalar-prefetched label, iota one-hot) + sigmoid."""
    d = pl.program_id(0)
    x = x_ref[0]                                                     # (m*m, C) bf16
    h = jnp.dot(x, w1_ref[...], preferred_element_type=jnp.float32) + b1_ref[...]
    h = jnp.maximum(h, 0.0)
    h = jnp.dot(h.astype(jnp.bfloat16), w2_ref[...],
                preferred_element_type=jnp.float32) + b2_ref[...]
    h = jnp.maximum(h, 0.0)
    logits = jnp.dot(h.astype(jnp.bfloat16), wp_ref[...],
                     preferred_element_type=jnp.float32) + bp_ref[...]  # (m*m, KP)

    label = labels_ref[d]
    onehot = (jax.lax.broadcasted_iota(jnp.int32, logits.shape, 1) == label)
    sel = jnp.sum(logits * onehot.astype(jnp.float32), axis=-1, keepdims=True)  # (m*m, 1)
    # sigmoid(select(x)) == select(sigmoid(x)); approx reciprocal OK for masks
    o_ref[0] = pl.reciprocal(1.0 + jnp.exp(-sel), approx=True)


# ----------------------------------------------------------------------------
# Separable bilinear weights (plain JAX, tiny) — replaces the dense one-hot matrix
# ----------------------------------------------------------------------------
def _separable_bilinear_weights(boxes, out_size, spatial_scale, sampling_ratio, H, W):
    """Per-ROI (P, H) and (P, W) interpolation/averaging weights (torchvision rules)."""
    R = boxes.shape[0]
    sr = sampling_ratio
    b = boxes.astype(jnp.float32) * spatial_scale
    x1, y1, x2, y2 = b[:, 0], b[:, 1], b[:, 2], b[:, 3]
    roi_w = jnp.maximum(x2 - x1, 1.0)
    roi_h = jnp.maximum(y2 - y1, 1.0)
    bin_w = roi_w / out_size
    bin_h = roi_h / out_size

    def axis_weights(start, bin_size, size):
        idx = jnp.arange(out_size * sr, dtype=jnp.float32)
        pos = start[:, None] + (idx[None, :] + 0.5) * (bin_size[:, None] / sr)
        # torchvision border rule: zero contribution outside (-1, size)
        in_range = ((pos >= -1.0) & (pos <= float(size))).astype(jnp.float32)
        pos_c = jnp.clip(pos, 0.0, float(size) - 1.0)
        lo = jnp.floor(pos_c).astype(jnp.int32)
        lo = jnp.minimum(lo, size - 1)
        hi = jnp.minimum(lo + 1, size - 1)
        frac = pos_c - lo.astype(jnp.float32)
        w_lo = (1.0 - frac) * in_range
        w_hi = frac * in_range
        w = (jax.nn.one_hot(lo, size, dtype=jnp.float32) * w_lo[..., None]
             + jax.nn.one_hot(hi, size, dtype=jnp.float32) * w_hi[..., None])
        return w.reshape(R, out_size, sr, size).sum(axis=2) / sr     # (R, P, size)

    wy = axis_weights(y1, bin_h, H)
    wx = axis_weights(x1, bin_w, W)
    return wy, wx


# ----------------------------------------------------------------------------
# host-side NMS helpers (dynamic shapes -> numpy glue)
# ----------------------------------------------------------------------------
def nms_np(boxes, scores, iou_thresh):
    order = np.argsort(-scores, kind="stable")
    keep = []
    while order.size > 0:
        i = order[0]
        keep.append(int(i))
        if order.size == 1:
            break
        rest = order[1:]
        xx1 = np.maximum(boxes[i, 0], boxes[rest, 0])
        yy1 = np.maximum(boxes[i, 1], boxes[rest, 1])
        xx2 = np.minimum(boxes[i, 2], boxes[rest, 2])
        yy2 = np.minimum(boxes[i, 3], boxes[rest, 3])
        inter = np.maximum(0.0, xx2 - xx1) * np.maximum(0.0, yy2 - yy1)
        area_i = (boxes[i, 2] - boxes[i, 0]) * (boxes[i, 3] - boxes[i, 1])
        area_r = (boxes[rest, 2] - boxes[rest, 0]) * (boxes[rest, 3] - boxes[rest, 1])
        iou = inter / (area_i + area_r - inter + 1e-9)
        order = rest[iou <= iou_thresh]
    return np.asarray(keep, dtype=np.int64)


def batched_nms_np(boxes, scores, labels, iou_thresh):
    if boxes.shape[0] == 0:
        return np.zeros((0,), dtype=np.int64)
    max_coord = boxes.max()
    offsets = labels.astype(boxes.dtype) * (max_coord + 1.0)
    shifted = boxes + offsets[:, None]
    return nms_np(shifted, scores, iou_thresh)


# ----------------------------------------------------------------------------
# RoIHeads
# ----------------------------------------------------------------------------
class RoIHeadsPallas:
    def __init__(self, params, *, bbox_reg_weights=None, score_thresh=0.05,
                 nms_thresh=0.5, detections_per_img=10,
                 pool_size=4, mask_pool_size=4, num_classes=5, sampling_ratio=2):
        if bbox_reg_weights is None:
            bbox_reg_weights = (10.0, 10.0, 5.0, 5.0)
        self.bbox_reg_weights = tuple(float(w) for w in bbox_reg_weights)
        self.score_thresh = score_thresh
        self.nms_thresh = nms_thresh
        self.detections_per_img = detections_per_img
        self.pool_size = pool_size
        self.mask_pool_size = mask_pool_size
        self.num_classes = num_classes
        self.sampling_ratio = sampling_ratio
        self.params = params

        K = num_classes
        P = pool_size
        seg = _round_up(K, LANE)
        self._seg = seg

        # --- box branch weight prep (bf16 MXU operands, f32 biases) -------------
        w6, b6 = params["fc6"]
        w6 = np.asarray(w6, np.float32)
        C = w6.shape[0] // (P * P)
        # rows from torch (C, Py, Px) flatten order -> (Py, Px, C), matching the
        # Pallas RoIAlign output layout (kills a host-side transpose).
        perm = np.arange(C * P * P).reshape(C, P, P).transpose(1, 2, 0).reshape(-1)
        self._w6 = jnp.asarray(w6[perm, :], jnp.bfloat16)
        self._b6 = jnp.asarray(np.asarray(b6, np.float32).reshape(1, -1))
        w7, b7 = params["fc7"]
        self._w7 = jnp.asarray(np.asarray(w7, np.float32), jnp.bfloat16)
        self._b7 = jnp.asarray(np.asarray(b7, np.float32).reshape(1, -1))

        # fused cls+bbox predictor: 128-aligned output segments
        wc, bc = params["cls"]
        wb, bb = params["bbox"]
        wc = np.asarray(wc, np.float32); bc = np.asarray(bc, np.float32)
        wb = np.asarray(wb, np.float32); bb = np.asarray(bb, np.float32)
        H2 = wc.shape[0]
        wp = np.zeros((H2, 5 * seg), np.float32)
        bp = np.zeros((5 * seg,), np.float32)
        wp[:, :K] = wc
        bp[:K] = bc
        bp[K:seg] = -1e9  # pad logits -> softmax contribution exactly 0
        for j in range(4):  # dx, dy, dw, dh coordinate-major segments
            cols = np.asarray([c * 4 + j for c in range(K)])
            wp[:, (j + 1) * seg:(j + 1) * seg + K] = wb[:, cols]
            bp[(j + 1) * seg:(j + 1) * seg + K] = bb[cols]
        self._wpred = jnp.asarray(wp, jnp.bfloat16)
        self._bpred = jnp.asarray(bp.reshape(1, -1))

        # --- mask branch weight prep --------------------------------------------
        if self.has_mask():
            w1, b1 = params["mask1"]
            w2, b2 = params["mask2"]
            wmp, bmp = params["mask_pred"]
            self._mw1 = jnp.asarray(np.asarray(w1, np.float32), jnp.bfloat16)
            self._mb1 = jnp.asarray(np.asarray(b1, np.float32).reshape(1, -1))
            self._mw2 = jnp.asarray(np.asarray(w2, np.float32), jnp.bfloat16)
            self._mb2 = jnp.asarray(np.asarray(b2, np.float32).reshape(1, -1))
            KP = _round_up(K, LANE)
            self._mkp = KP
            wmp = np.asarray(wmp, np.float32)
            bmp = np.asarray(bmp, np.float32)
            self._mwp = jnp.asarray(np.pad(wmp, ((0, 0), (0, KP - K))), jnp.bfloat16)
            self._mbp = jnp.asarray(np.pad(bmp, (0, KP - K)).reshape(1, -1))

    def has_mask(self):
        return all(k in self.params for k in ("mask1", "mask2", "mask_pred"))

    # --- RoIAlign (Pallas, separable, scalar-prefetched batch index) ------------
    def _roi_align_call(self, feat_flat, wy, wx, batch_idx, P, W, C):
        R = int(wy.shape[0])
        N, H, WC = (int(s) for s in feat_flat.shape)
        kernel = functools.partial(_roi_align_kernel, P=P, W=W, C=C)
        vmem = _vmem_limit_bytes([P * H * 4, P * W * 4, H * WC * 4, P * P * C * 2])
        return pl.pallas_call(
            kernel,
            grid_spec=pltpu.PrefetchScalarGridSpec(
                num_scalar_prefetch=1,
                grid=(R,),
                in_specs=[
                    pl.BlockSpec((1, P, H), lambda r, b: (r, 0, 0)),
                    pl.BlockSpec((1, P, W), lambda r, b: (r, 0, 0)),
                    # per-ROI image slab; ROIs are grouped per image so the block
                    # index repeats and the slab is only DMA'd on image change.
                    pl.BlockSpec((1, H, WC), lambda r, b: (b[r], 0, 0)),
                ],
                out_specs=pl.BlockSpec((1, P * P, C), lambda r, b: (r, 0, 0)),
            ),
            out_shape=jax.ShapeDtypeStruct((R, P * P, C), jnp.bfloat16),
            compiler_params=pltpu.CompilerParams(
                dimension_semantics=("parallel",),
                vmem_limit_bytes=vmem),
        )(batch_idx, wy, wx, feat_flat)

    # --- fused box head (tiled over R) -------------------------------------------
    def _run_box_head(self, box_x, props):
        R, Kin = (int(s) for s in box_x.shape)
        H1 = int(self._w6.shape[1])
        H2 = int(self._w7.shape[1])
        seg = self._seg
        TR = 128 if R >= 128 else _round_up(max(R, 8), 8)
        R_pad = _round_up(R, TR)
        if R_pad != R:
            box_x = jnp.pad(box_x, ((0, R_pad - R), (0, 0)))
            props = jnp.pad(props, ((0, R_pad - R), (0, 0)))
        vmem = _vmem_limit_bytes([
            TR * Kin * 2, Kin * H1 * 2, H1 * 4, H1 * H2 * 2, H2 * 4,
            H2 * 5 * seg * 2, 5 * seg * 4, TR * 4 * 4, TR * 5 * seg * 4])
        kernel = functools.partial(_box_head_kernel, seg=seg,
                                   box_weights=self.bbox_reg_weights)
        out = pl.pallas_call(
            kernel,
            grid_spec=pltpu.PrefetchScalarGridSpec(
                num_scalar_prefetch=0,
                grid=(R_pad // TR,),
                in_specs=[
                    pl.BlockSpec((TR, Kin), lambda i: (i, 0)),
                    pl.BlockSpec((Kin, H1), lambda i: (0, 0)),   # resident weights
                    pl.BlockSpec((1, H1), lambda i: (0, 0)),
                    pl.BlockSpec((H1, H2), lambda i: (0, 0)),
                    pl.BlockSpec((1, H2), lambda i: (0, 0)),
                    pl.BlockSpec((H2, 5 * seg), lambda i: (0, 0)),
                    pl.BlockSpec((1, 5 * seg), lambda i: (0, 0)),
                    pl.BlockSpec((TR, 4), lambda i: (i, 0)),
                ],
                out_specs=pl.BlockSpec((TR, 5 * seg), lambda i: (i, 0)),
            ),
            out_shape=jax.ShapeDtypeStruct((R_pad, 5 * seg), jnp.float32),
            compiler_params=pltpu.CompilerParams(
                dimension_semantics=("parallel",),   # row tiles across v7x TCs
                vmem_limit_bytes=vmem),
        )(box_x, self._w6, self._b6, self._w7, self._b7,
          self._wpred, self._bpred, props.astype(jnp.float32))
        return out[:R]

    # --- fused mask head (per-detection grid, selected class only) ----------------
    def _run_mask_head(self, pooled_m, labels_flat):
        D, mm, C = (int(s) for s in pooled_m.shape)
        H1 = int(self._mw1.shape[1])
        H2 = int(self._mw2.shape[1])
        KP = self._mkp
        vmem = _vmem_limit_bytes([
            mm * C * 2, C * H1 * 2, H1 * 4, H1 * H2 * 2, H2 * 4,
            H2 * KP * 2, KP * 4, mm * 4])
        return pl.pallas_call(
            _mask_head_kernel,
            grid_spec=pltpu.PrefetchScalarGridSpec(
                num_scalar_prefetch=1,
                grid=(D,),
                in_specs=[
                    pl.BlockSpec((1, mm, C), lambda d, lbl: (d, 0, 0)),
                    pl.BlockSpec((C, H1), lambda d, lbl: (0, 0)),
                    pl.BlockSpec((1, H1), lambda d, lbl: (0, 0)),
                    pl.BlockSpec((H1, H2), lambda d, lbl: (0, 0)),
                    pl.BlockSpec((1, H2), lambda d, lbl: (0, 0)),
                    pl.BlockSpec((H2, KP), lambda d, lbl: (0, 0)),
                    pl.BlockSpec((1, KP), lambda d, lbl: (0, 0)),
                ],
                out_specs=pl.BlockSpec((1, mm, 1), lambda d, lbl: (d, 0, 0)),
            ),
            out_shape=jax.ShapeDtypeStruct((D, mm, 1), jnp.float32),
            compiler_params=pltpu.CompilerParams(
                dimension_semantics=("parallel",),
                vmem_limit_bytes=vmem),
        )(labels_flat, pooled_m, self._mw1, self._mb1, self._mw2, self._mb2,
          self._mwp, self._mbp)

    # --- postprocess (host-side numpy, dynamic shapes) ---------------------------
    def postprocess_detections(self, fused_np, boxes_per_image, image_shapes):
        K = self.num_classes
        seg = self._seg
        scores_full = fused_np[:, :K]
        x1 = fused_np[:, 1 * seg:1 * seg + K]
        y1 = fused_np[:, 2 * seg:2 * seg + K]
        x2 = fused_np[:, 3 * seg:3 * seg + K]
        y2 = fused_np[:, 4 * seg:4 * seg + K]
        boxes_full = np.stack([x1, y1, x2, y2], axis=-1)             # (R, K, 4)

        all_boxes, all_scores, all_labels = [], [], []
        start = 0
        for n_img, image_shape in zip(boxes_per_image, image_shapes):
            boxes = boxes_full[start:start + n_img].copy()            # (n, K, 4)
            scores = scores_full[start:start + n_img].copy()          # (n, K)
            start += n_img
            h, w = image_shape

            # clip_boxes_to_image
            boxes[..., 0::2] = np.clip(boxes[..., 0::2], 0.0, float(w))
            boxes[..., 1::2] = np.clip(boxes[..., 1::2], 0.0, float(h))

            labels = np.broadcast_to(np.arange(K), scores.shape).copy()

            # drop background class
            boxes = boxes[:, 1:].reshape(-1, 4)
            scores = scores[:, 1:].reshape(-1)
            labels = labels[:, 1:].reshape(-1)

            inds = np.where(scores > self.score_thresh)[0]
            boxes, scores, labels = boxes[inds], scores[inds], labels[inds]

            ws = boxes[:, 2] - boxes[:, 0]
            hs = boxes[:, 3] - boxes[:, 1]
            keep = np.where((ws >= 0.01) & (hs >= 0.01))[0]
            boxes, scores, labels = boxes[keep], scores[keep], labels[keep]

            keep = batched_nms_np(boxes, scores, labels, self.nms_thresh)
            keep = keep[: self.detections_per_img]
            boxes, scores, labels = boxes[keep], scores[keep], labels[keep]

            all_boxes.append(jnp.asarray(boxes, jnp.float32))
            all_scores.append(jnp.asarray(scores, jnp.float32))
            all_labels.append(jnp.asarray(labels, jnp.int32))
        return all_boxes, all_scores, all_labels

    # --- forward -----------------------------------------------------------------
    def forward(self, features, proposals, image_shapes, targets=None):
        N, C, Hf, Wf = (int(s) for s in features.shape)
        P = self.pool_size

        # NHWC feature slabs, channels on lanes.
        feat_flat = jnp.transpose(features, (0, 2, 3, 1)).reshape(N, Hf, Wf * C)
        feat_flat = feat_flat.astype(jnp.float32)
        # TODO(synk): per-image / per-FPN-level spatial scales; torchvision uses one
        # scale per level derived from the batch-common padded image size.
        spatial_scale = Hf / float(image_shapes[0][0])

        concat_props = jnp.concatenate(proposals, axis=0).astype(jnp.float32)
        batch_idx = jnp.concatenate(
            [jnp.full((int(p.shape[0]),), i, jnp.int32) for i, p in enumerate(proposals)])
        R = int(concat_props.shape[0])

        # box branch: separable Pallas RoIAlign + one fused, R-tiled head kernel
        wy, wx = _separable_bilinear_weights(
            concat_props, P, spatial_scale, self.sampling_ratio, Hf, Wf)
        pooled = self._roi_align_call(feat_flat, wy, wx, batch_idx, P, Wf, C)  # (R,P*P,C) bf16
        box_x = pooled.reshape(R, P * P * C)                                    # matches perm'd fc6

        fused = self._run_box_head(box_x, concat_props)
        fused_np = np.asarray(jax.device_get(fused))   # single host transfer (scores+boxes)

        boxes_per_image = [int(p.shape[0]) for p in proposals]
        boxes, scores, labels = self.postprocess_detections(
            fused_np, boxes_per_image, image_shapes)

        result = []
        losses = {}
        for i in range(len(boxes)):
            result.append({"boxes": boxes[i], "labels": labels[i], "scores": scores[i]})

        if self.has_mask():
            # Pad detections to detections_per_img per image so the mask kernels
            # always run at static shapes (no recompilation per NMS count).
            det_max = self.detections_per_img
            n_img = len(result)
            m = self.mask_pool_size
            pad_boxes = np.zeros((n_img, det_max, 4), np.float32)
            pad_labels = np.zeros((n_img, det_max), np.int32)
            counts = []
            for i, r in enumerate(result):
                b = np.asarray(r["boxes"], np.float32)
                l = np.asarray(r["labels"], np.int32)
                n = min(int(b.shape[0]), det_max)
                counts.append(n)
                if n > 0:
                    pad_boxes[i, :n] = b[:n]
                    pad_labels[i, :n] = l[:n]

            D = n_img * det_max
            mask_rois = jnp.asarray(pad_boxes.reshape(D, 4))
            mask_bidx = jnp.asarray(np.repeat(np.arange(n_img, dtype=np.int32), det_max))
            wym, wxm = _separable_bilinear_weights(
                mask_rois, m, spatial_scale, self.sampling_ratio, Hf, Wf)
            pooled_m = self._roi_align_call(feat_flat, wym, wxm, mask_bidx, m, Wf, C)
            labels_flat = jnp.asarray(pad_labels.reshape(D))
            probs = self._run_mask_head(pooled_m, labels_flat)       # (D, m*m, 1) f32

            probs_np = np.asarray(jax.device_get(probs)).reshape(n_img, det_max, m, m)
            for i, r in enumerate(result):
                r["masks"] = jnp.asarray(probs_np[i, :counts[i], None, :, :])
        return result, losses


# ----------------------------------------------------------------------------
# main
# ----------------------------------------------------------------------------
if __name__ == "__main__":
    key = jax.random.PRNGKey(0)
    N, C, Hf, Wf = 2, 4, 16, 16
    img_h, img_w = 32, 32
    num_props = 8
    pool_size = 4
    mask_pool_size = 4
    rep_size = 32
    mask_hidden = 8
    num_classes = 5  # incl. background

    keys = jax.random.split(key, 12)
    features = jax.random.normal(keys[0], (N, C, Hf, Wf), jnp.float32)

    def make_props(k):
        k1, k2, k3, k4 = jax.random.split(k, 4)
        x1 = jax.random.uniform(k1, (num_props,), minval=0.0, maxval=img_w * 0.6)
        y1 = jax.random.uniform(k2, (num_props,), minval=0.0, maxval=img_h * 0.6)
        w = jax.random.uniform(k3, (num_props,), minval=4.0, maxval=img_w * 0.4)
        h = jax.random.uniform(k4, (num_props,), minval=4.0, maxval=img_h * 0.4)
        return jnp.stack(
            [x1, y1, jnp.minimum(x1 + w, float(img_w)), jnp.minimum(y1 + h, float(img_h))],
            axis=-1,
        ).astype(jnp.float32)

    proposals = [make_props(keys[1]), make_props(keys[2])]
    image_shapes = [(img_h, img_w)] * N

    def init_linear(k, fan_in, fan_out):
        kw, kb = jax.random.split(k)
        w = jax.random.normal(kw, (fan_in, fan_out), jnp.float32) * 0.1
        b = jax.random.normal(kb, (fan_out,), jnp.float32) * 0.01
        return w, b

    params = {
        "fc6": init_linear(keys[3], C * pool_size * pool_size, rep_size),
        "fc7": init_linear(keys[4], rep_size, rep_size),
        "cls": init_linear(keys[5], rep_size, num_classes),
        "bbox": init_linear(keys[6], rep_size, num_classes * 4),
        "mask1": init_linear(keys[7], C, mask_hidden),
        "mask2": init_linear(keys[8], mask_hidden, mask_hidden),
        "mask_pred": init_linear(keys[9], mask_hidden, num_classes),
    }

    heads = RoIHeadsPallas(
        params,
        bbox_reg_weights=None,           # -> (10, 10, 5, 5) like the reference
        score_thresh=0.05,
        nms_thresh=0.5,
        detections_per_img=10,
        pool_size=pool_size,
        mask_pool_size=mask_pool_size,
        num_classes=num_classes,
    )

    result, losses = heads.forward(features, proposals, image_shapes)
    jax.block_until_ready(result)

    # light sanity checks
    assert len(result) == N
    for r in result:
        assert r["boxes"].shape[0] == r["scores"].shape[0] == r["labels"].shape[0]
        assert r["boxes"].shape[-1] == 4
        assert r["masks"].shape[0] == r["boxes"].shape[0]
        assert r["masks"].shape[1:] == (1, mask_pool_size, mask_pool_size)
        assert bool(jnp.all(jnp.isfinite(r["boxes"])))
        assert bool(jnp.all(jnp.isfinite(r["masks"])))
    assert losses == {}

    print("KERNEL_OK")
</pallas_src>

<mosaic_0001>
module attributes {stable_mosaic.version = 11 : i64} {
  func.func @_roi_align_kernel(%arg0: i32, %arg1: memref<16xi32, #tpu.memory_space<smem>>, %arg2: memref<1x4x16xf32, #tpu.memory_space<vmem>>, %arg3: memref<1x4x16xf32, #tpu.memory_space<vmem>>, %arg4: memref<1x16x64xf32, #tpu.memory_space<vmem>>, %arg5: memref<1x16x4xbf16, #tpu.memory_space<vmem>>) attributes {dimension_semantics = [#tpu.dimension_semantics<parallel>], iteration_bounds = array<i64: 16>, scalar_prefetch = 1 : i64, scratch_operands = 0 : i64, tpu.core_type = #tpu.core_type<tc>, window_params = [{transform_indices = @transform_0, window_bounds = array<i64: 1, 4, 16>}, {transform_indices = @transform_1, window_bounds = array<i64: 1, 4, 16>}, {transform_indices = @transform_2, window_bounds = array<i64: 1, 16, 64>}, {transform_indices = @transform_3, window_bounds = array<i64: 1, 16, 4>}]} {
    %c0 = arith.constant 0 : index
    %c0_0 = arith.constant 0 : index
    %c0_1 = arith.constant 0 : index
    %0 = vector.load %arg2[%c0, %c0_0, %c0_1] : memref<1x4x16xf32, #tpu.memory_space<vmem>>, vector<1x4x16xf32>
    %1 = vector.shape_cast %0 : vector<1x4x16xf32> to vector<4x16xf32>
    %c0_2 = arith.constant 0 : index
    %c0_3 = arith.constant 0 : index
    %c0_4 = arith.constant 0 : index
    %2 = vector.load %arg3[%c0_2, %c0_3, %c0_4] : memref<1x4x16xf32, #tpu.memory_space<vmem>>, vector<1x4x16xf32>
    %3 = vector.shape_cast %2 : vector<1x4x16xf32> to vector<4x16xf32>
    %c0_5 = arith.constant 0 : index
    %c0_6 = arith.constant 0 : index
    %c0_7 = arith.constant 0 : index
    %4 = vector.load %arg4[%c0_5, %c0_6, %c0_7] : memref<1x16x64xf32, #tpu.memory_space<vmem>>, vector<1x16x64xf32>
    %5 = vector.shape_cast %4 : vector<1x16x64xf32> to vector<16x64xf32>
    %cst = arith.constant dense<0.000000e+00> : vector<4x64xf32>
    %6 = tpu.matmul %1, %5, %cst {dimension_numbers = #tpu.dot_dimension_numbers<[1], [0], [0], [1], [0, 0, 1, 1], [], []>} : vector<4x16xf32>, vector<16x64xf32>, vector<4x64xf32> -> vector<4x64xf32>
    %7 = vector.shape_cast %6 : vector<4x64xf32> to vector<4x16x4xf32>
    %8 = vector.extract_strided_slice %7 {offsets = [0, 0, 0], sizes = [1, 16, 4], strides = [1, 1, 1]} : vector<4x16x4xf32> to vector<1x16x4xf32>
    %9 = vector.shape_cast %8 : vector<1x16x4xf32> to vector<16x4xf32>
    %cst_8 = arith.constant dense<0.000000e+00> : vector<4x4xf32>
    %10 = tpu.matmul %3, %9, %cst_8 {dimension_numbers = #tpu.dot_dimension_numbers<[1], [0], [0], [1], [0, 0, 1, 1], [], []>} : vector<4x16xf32>, vector<16x4xf32>, vector<4x4xf32> -> vector<4x4xf32>
    %11 = vector.extract_strided_slice %7 {offsets = [1, 0, 0], sizes = [1, 16, 4], strides = [1, 1, 1]} : vector<4x16x4xf32> to vector<1x16x4xf32>
    %12 = vector.shape_cast %11 : vector<1x16x4xf32> to vector<16x4xf32>
    %cst_9 = arith.constant dense<0.000000e+00> : vector<4x4xf32>
    %13 = tpu.matmul %3, %12, %cst_9 {dimension_numbers = #tpu.dot_dimension_numbers<[1], [0], [0], [1], [0, 0, 1, 1], [], []>} : vector<4x16xf32>, vector<16x4xf32>, vector<4x4xf32> -> vector<4x4xf32>
    %14 = vector.extract_strided_slice %7 {offsets = [2, 0, 0], sizes = [1, 16, 4], strides = [1, 1, 1]} : vector<4x16x4xf32> to vector<1x16x4xf32>
    %15 = vector.shape_cast %14 : vector<1x16x4xf32> to vector<16x4xf32>
    %cst_10 = arith.constant dense<0.000000e+00> : vector<4x4xf32>
    %16 = tpu.matmul %3, %15, %cst_10 {dimension_numbers = #tpu.dot_dimension_numbers<[1], [0], [0], [1], [0, 0, 1, 1], [], []>} : vector<4x16xf32>, vector<16x4xf32>, vector<4x4xf32> -> vector<4x4xf32>
    %17 = vector.extract_strided_slice %7 {offsets = [3, 0, 0], sizes = [1, 16, 4], strides = [1, 1, 1]} : vector<4x16x4xf32> to vector<1x16x4xf32>
    %18 = vector.shape_cast %17 : vector<1x16x4xf32> to vector<16x4xf32>
    %cst_11 = arith.constant dense<0.000000e+00> : vector<4x4xf32>
    %19 = tpu.matmul %3, %18, %cst_11 {dimension_numbers = #tpu.dot_dimension_numbers<[1], [0], [0], [1], [0, 0, 1, 1], [], []>} : vector<4x16xf32>, vector<16x4xf32>, vector<4x4xf32> -> vector<4x4xf32>
    %20 = tpu.concatenate %10, %13, %16, %19 in 0 : vector<4x4xf32>, vector<4x4xf32>, vector<4x4xf32>, vector<4x4xf32> -> vector<16x4xf32>
    %21 = arith.truncf %20 : vector<16x4xf32> to vector<16x4xbf16>
    %c0_12 = arith.constant 0 : index
    %c0_13 = arith.constant 0 : index
    %c0_14 = arith.constant 0 : index
    %22 = vector.load %arg5[%c0_12, %c0_13, %c0_14] : memref<1x16x4xbf16, #tpu.memory_space<vmem>>, vector<1x16x4xbf16>
    %23 = vector.shape_cast %22 : vector<1x16x4xbf16> to vector<16x4xbf16>
    %24 = vector.shape_cast %21 : vector<16x4xbf16> to vector<1x16x4xbf16>
    tpu.vector_store %arg5[%c0_12, %c0_13, %c0_14], %24 {strides = array<i32>} : memref<1x16x4xbf16, #tpu.memory_space<vmem>>, vector<1x16x4xbf16>,
    return
  }
  func.func @transform_0(%arg0: i32, %arg1: memref<16xi32, #tpu.memory_space<smem>>) -> (i32, i32, i32) {
    %c0_i32 = arith.constant 0 : i32
    %c0_i32_0 = arith.constant 0 : i32
    %c0_i32_1 = arith.constant 0 : i32
    return %arg0, %c0_i32, %c0_i32_0 : i32, i32, i32
  }
  func.func @transform_1(%arg0: i32, %arg1: memref<16xi32, #tpu.memory_space<smem>>) -> (i32, i32, i32) {
    %c0_i32 = arith.constant 0 : i32
    %c0_i32_0 = arith.constant 0 : i32
    %c0_i32_1 = arith.constant 0 : i32
    return %arg0, %c0_i32, %c0_i32_0 : i32, i32, i32
  }
  func.func @transform_2(%arg0: i32, %arg1: memref<16xi32, #tpu.memory_space<smem>>) -> (i32, i32, i32) {
    %0 = arith.index_cast %arg0 : i32 to index
    %1 = memref.load %arg1[%0] : memref<16xi32, #tpu.memory_space<smem>>
    %c0_i32 = arith.constant 0 : i32
    %c0_i32_0 = arith.constant 0 : i32
    %c0_i32_1 = arith.constant 0 : i32
    return %1, %c0_i32, %c0_i32_0 : i32, i32, i32
  }
  func.func @transform_3(%arg0: i32, %arg1: memref<16xi32, #tpu.memory_space<smem>>) -> (i32, i32, i32) {
    %c0_i32 = arith.constant 0 : i32
    %c0_i32_0 = arith.constant 0 : i32
    %c0_i32_1 = arith.constant 0 : i32
    return %arg0, %c0_i32, %c0_i32_0 : i32, i32, i32
  }
}

</mosaic_0001>

<bundles_post_ra>
// kernel: tpu_custom_call.1
= control target key start
LH: loop header
LB: loop body
LE: loop exit
PB: predicated region body
PF: predicated region fallthrough
CT: control target
= control target key end

     0   :  { %s1680_s0 = inlined_call_operand.hbm [shape: s32[16], index: 0, kind: input, shape index: {}]   ;;  %s1681_s1 = inlined_call_operand.hbm [shape: f32[16,4,16], index: 1, kind: input, shape index: {}]   ;;  %s1682_s2 = inlined_call_operand.hbm [shape: f32[16,4,16], index: 2, kind: input, shape index: {}]   ;;  %s1683_s3 = inlined_call_operand.hbm [shape: f32[2,16,64], index: 3, kind: input, shape index: {}]   ;;  %s1684_s4 = inlined_call_operand.vmem [shape: bf16[16,16,4], index: 4, kind: output, shape index: {}]  }
   0x1   :  { %1689 = sst [smem:[#allocation16_spill]] %s1682_s2  ;;  %s1138_s17 = scalar_lea.hbm %s1680_s0, 16 }
   0x2   :  { %p1139_p0 = scmp.ne.s32.totalorder %s1680_s0, %s1138_s17  ;;  %p1142_p1 = scmp.lt.u32.totalorder %s1138_s17, %s1680_s0 }
   0x4   :  { %p1144_p2 = pnand %p1142_p1, %p1139_p0 }
   0x6   :  { %1147 = shalt.err (!%p1144_p2)  }
   0x7   :  { %s1308_s22 = smov [#allocation3]  }
   0x8   :  { %10 = dma.hbm_to_smem %s1680_s0, 16, %s1308_s22, [#allocation2] }
   0x9   :  { %1266 = dma.done.wait [#allocation2], 16 }
   0xa   :  { %1267 = vsyncadd [#allocation2], 4294967280 }
   0xb   :  { %12 = sfence }
   0xc   :  { %13 = vsyncpa [#allocation5], 0 }
   0xd   :  { %15 = vsyncpa [#allocation5 + $0x1], 0 }
   0xe   :  { %16 = vsyncpa [#allocation7], 0 }
   0xf   :  { %18 = vsyncpa [#allocation7 + $0x1], 0  ;;  %s1371_s25 = smov 0   ;;  %s1373_s26 = smov 0  }
  0x10   :  { %s1375_s27 = smov 0   ;;  %s1377_s28 = smov 0  }
  0x11   :  { %s1379_s29 = smov 0   ;;  %s1381_s30 = smov 0  }
  0x12   :  { %s1383_s0 = smov 0  }
  0x13 LB: > { %s1403_s5 = sadd.s32 4294967295, %s1306_s0   ;;  %s1406_s6 = sadd.s32 1, %s1306_s0   ;;  %s1306_s0 = sphi %s1383_s0, %s1712_s0   ;;  %s1302_s30 = sphi %s1381_s30, %s1711_s30   ;;  %s1298_s29 = sphi %s1379_s29, %s1710_s29   ;;  %s1294_s28 = sphi %s1377_s28, %s1709_s28   ;;  %s1290_s27 = sphi %s1375_s27, %s1708_s27   ;;  %s1286_s26 = sphi %s1373_s26, %s1707_s26   ;;  %s1282_s25 = sphi %s1371_s25, %s1706_s25  }
  0x14   : > { %s28_s7 = ssub.s32 %s1306_s0, %s1406_s6  ;;  %s31_s8 = sadd.s32 1, %s1302_s30 }
  0x15   : > { %p29_p3 = scmp.eq.s32.totalorder %s28_s7, 0  ;;  %p38_p4 = scmp.ne.s32.totalorder %s1302_s30, %s1298_s29 }
  0x16   : > { %p39_p5 = scmp.eq.s32.totalorder %s1306_s0, 0  ;;  %p44_p6 = scmp.ne.s32.totalorder %s1298_s29, %s1294_s28 }
  0x17   : > { %s1416_s9 = scalar_select %p29_p3, %s1302_s30, %s31_s8  }
  0x18   : > { %p1418_p7 = por %p39_p5, %p38_p4  ;;  %p45_p8 = scmp.eq.s32.totalorder %s1403_s5, 0 }
  0x19   : > { %1690 = sst [smem:[#allocation15_spill]] %s1416_s9  ;;  %s85_s14 = sadd.s32 1, %s1290_s27 }
  0x1a   : > { %s80_s11 = sld [smem:[#allocation3 + %s1306_s0]]  ;;  %p1425_p9 = por %p45_p8, %p44_p6 }
  0x1b   : > { %s81_s12 = sld [smem:[#allocation3 + %s1406_s6]]  ;;  %p92_p10 = scmp.ne.s32.totalorder %s1290_s27, %s1286_s26 }
  0x1c   : > { %s1692_s13 = scalar_select %p1425_p9, 1, 0 }
  0x1d   : > { %p98_p11 = scmp.ne.s32.totalorder %s1286_s26, %s1282_s25  ;;  %p1685_p12 = scmp.lt.s32.totalorder %s1306_s0, 16 }
  0x1e   : > { %p1434_p13 = por %p92_p10, %p39_p5  ;;  %s148_s17 = sand.u32 1, %s1302_s30  }
  0x1f   : > { %p1438_p0 = por %p98_p11, %p45_p8  ;;  %s948_s18 = sshll.u32 %s1306_s0, 6 }
  0x20   : > { %s1446_s20 = sshll.u32 %s148_s17, 2  ;;  %p1452_p2 = pnand %p1685_p12, %p1418_p7 }
  0x21   : > { %s1694_s16 = scalar_select %p1438_p0, 1, 0 }
  0x22   : > { %s82_s19 = ssub.s32 %s80_s11, %s81_s12  ;;  %s166_s22 = sand.u32 1, %s1306_s0  }
  0x23   : > { %p83_p1 = scmp.eq.s32.totalorder %s82_s19, 0  ;;  %s1696_s2 = sld [smem:[#allocation16_spill]] }
  0x24   : > { %s170_s7 = scalar_lea.vmem [#allocation6], %s1446_s20  ;;  %p1474_p3 = pnand %p1685_p12, %p1434_p13 }
  0x25   : > { %s1458_s23 = scalar_select %p83_p1, %s1290_s27, %s85_s14  }
  0x26   : > { %s177_s8 = sshll.u32 %s170_s7, 4  ;;  %s1478_s11 = scalar_lea.sflag [#allocation7], %s166_s22  ;;  %s1468_s8 = int_to_ptr.vmem [resolvable:$true] %s177_s8 }
  0x27   : > { %s1697_s10 = scalar_select %p1474_p3, 1, 0 }
  0x28   : > { %p1150_p5 = pneg %p1452_p2 }
  0x29   : > { %s1465_s28 = scalar_lea.hbm %s1696_s2, %s948_s18  ;;  %s1153_s24 = scalar_lea.hbm %s1696_s2, 1024 }
  0x2a   : > { %s1148_s12 = scalar_lea.hbm %s1465_s28, 64  ;;  %p1154_p8 = scmp.lt.u32.totalorder %s1465_s28, %s1696_s2 }
  0x2b   : > { %p1149_p4 = scmp.ne.s32.totalorder %s1465_s28, %s1148_s12  ;;  %p1155_p10 = scmp.lt.u32.totalorder %s1153_s24, %s1148_s12 }
  0x2c   : > { %p1157_p1 = scmp.lt.u32.totalorder %s1148_s12, %s1465_s28 }
  0x2d   : > { %p1151_p6 = pnand %p1150_p5, %p1149_p4  ;;  %p1156_p11 = por %p1155_p10, %p1154_p8 }
  0x2f   : > { %p1152_p7 = pneg %p1151_p6  ;;  %p1158_p12 = por %p1157_p1, %p1156_p11 }
  0x31   : > { %p1159_p0 = pnand %p1158_p12, %p1152_p7 }
  0x33   : > { %1162 = shalt.err (!%p1159_p0)
}
  0x34   : > { %s1163_s22 = scalar_lea.vmem %s1468_s8, 64  ;;  %s1309_s14 = smov [#allocation6]  }
  0x35   : > { %p1164_p4 = scmp.ne.s32.totalorder %s1468_s8, %s1163_s22  ;;  %s1168_s19 = sshll.u32 %s1309_s14, 4  ;;  %s1169_s19 = int_to_ptr.vmem [resolvable:$false] %s1168_s19 }
  0x36   : > { %s1170_s25 = scalar_lea.vmem %s1169_s19, 128  ;;  %p1171_p3 = scmp.lt.s32.totalorder %s1468_s8, %s1169_s19 }
  0x37   : > { %p1166_p6 = pnand %p1164_p4, %p1150_p5  ;;  %p1172_p8 = scmp.lt.s32.totalorder %s1170_s25, %s1163_s22 }
  0x39   : > { %p1167_p9 = pneg %p1166_p6  ;;  %p1173_p10 = por %p1172_p8, %p1171_p3 }
  0x3b   : > { %p1174_p11 = pnand %p1173_p10, %p1167_p9 }
  0x3d   : > { %1177 = shalt.err (!%p1174_p11)
}
  0x3e   : > { %1052 = dma.hbm_to_vmem [thread:$0]  (!%p1452_p2), %s1465_s28, 64, %s1468_s8, %s1478_s11  }
  0x3f   : > { %p954_p12 = scmp.ge.s32.totalorder %s1306_s0, 1  ;;  %p204_p0 = scmp.lt.s32.totalorder %s1306_s0, 17 }
  0x40   : > { %s1513_s7 = scalar_lea.hbm %s1681_s1, %s948_s18  ;;  %s152_s14 = scalar_lea.vmem [#allocation4], %s1446_s20 }
  0x41   : > { %p1515_p9 = pnand %p954_p12, %p204_p0  ;;  %s159_s19 = sshll.u32 %s152_s14, 4  ;;  %s1520_s19 = int_to_ptr.vmem [resolvable:$true] %s159_s19 }
  0x42   : > { %s186_s28 = sand.u32 1, %s1290_s27   ;;  %s149_s8 = scalar_lea.sflag [#allocation5], %s148_s17 }
  0x43   : > { %s1698_s22 = scalar_select %p1515_p9, 1, 0 }
  0x44   : > { %s1178_s25 = scalar_lea.hbm %s1513_s7, 64  ;;  %s1183_s24 = scalar_lea.hbm %s1681_s1, 1024 }
  0x45   : > { %p1179_p3 = scmp.ne.s32.totalorder %s1513_s7, %s1178_s25  ;;  %p1184_p4 = scmp.lt.u32.totalorder %s1513_s7, %s1681_s1 }
  0x46   : > { %p1185_p6 = scmp.lt.u32.totalorder %s1183_s24, %s1178_s25  ;;  %p1187_p10 = scmp.lt.u32.totalorder %s1178_s25, %s1513_s7 }
  0x47   : > { %p1181_p7 = pnand %p1179_p3, %p1150_p5 }
  0x48   : > { %p1186_p8 = por %p1185_p6, %p1184_p4 }
  0x49   : > { %p1182_p1 = pneg %p1181_p7 }
  0x4a   : > { %p1188_p11 = por %p1187_p10, %p1186_p8 }
  0x4c   : > { %p1189_p12 = pnand %p1188_p11, %p1182_p1 }
  0x4e   : > { %1192 = shalt.err (!%p1189_p12)
}
  0x4f   : > { %s1193_s17 = scalar_lea.vmem %s1520_s19, 64  ;;  %s1310_s20 = smov [#allocation4]  }
  0x50   : > { %p1194_p0 = scmp.ne.s32.totalorder %s1520_s19, %s1193_s17  ;;  %s1198_s14 = sshll.u32 %s1310_s20, 4  ;;  %s1199_s14 = int_to_ptr.vmem [resolvable:$false] %s1198_s14 }
  0x51   : > { %s1200_s2 = scalar_lea.vmem %s1199_s14, 128  ;;  %p1201_p9 = scmp.lt.s32.totalorder %s1520_s19, %s1199_s14 }
  0x52   : > { %p1196_p3 = pnand %p1194_p0, %p1150_p5  ;;  %p1202_p4 = scmp.lt.s32.totalorder %s1200_s2, %s1193_s17 }
  0x54   : > { %p1197_p7 = pneg %p1196_p3  ;;  %p1203_p6 = por %p1202_p4, %p1201_p9 }
  0x56   : > { %p1204_p8 = pnand %p1203_p6, %p1197_p7 }
  0x58   : > { %1207 = shalt.err (!%p1204_p8)
}
  0x59   : > { %1049 = dma.hbm_to_vmem [thread:$0]  (!%p1452_p2), %s1513_s7, 64, %s1520_s19, %s149_s8  }
  0x5a   : > { %s951_s9 = sshll.u32 %s186_s28, 4  ;;  %p1699_p5 = scmp.lt.s32.totalorder %s1306_s0, 16 }
  0x5b   : > { %s1040_s25 = scalar_select %p1434_p13, [#allocation3], [#allocation9] }
  0x5c   : > { %s1041_s18 = scalar_select %p1434_p13, %s1306_s0, 0 }
  0x5d   : > { %s1714_s25 = smov (!%p1699_p5, %s1040_s25), [#allocation10]  ;;  %p1700_p9 = pmov %p1699_p5 }
  0x5e   : > { %s188_s12 = scalar_lea.vmem [#allocation8], %s951_s9  ;;  %p1701_p2 = scmp.ne.s32.totalorder %s1697_s10, 0 }
  0x5f   : > { %s1716_s18 = smov (!%p1700_p9, %s1041_s18), 0  ;;  %s196_s24 = sshll.u32 %s188_s12, 4  ;;  %s1559_s24 = int_to_ptr.vmem [resolvable:$true] %s196_s24 }
  0x60   : > { %s189_s21 = sld [smem:[%s1714_s25 + %s1716_s18]]  ;;  %p1210_p1 = pneg %p1701_p2 }
  0x61   : > { %s1213_s28 = scalar_lea.hbm %s1683_s3, 512 }
  0x66   : > { %s969_s17 = sshll.u32 %s189_s21, 8 }
  0x67   : > { %s1564_s7 = scalar_lea.hbm %s1683_s3, %s969_s17 }
  0x68   : > { %s1208_s15 = scalar_lea.hbm %s1564_s7, 256  ;;  %p1214_p12 = scmp.lt.u32.totalorder %s1564_s7, %s1683_s3 }
  0x69   : > { %p1209_p13 = scmp.ne.s32.totalorder %s1564_s7, %s1208_s15  ;;  %p1215_p0 = scmp.lt.u32.totalorder %s1213_s28, %s1208_s15 }
  0x6a   : > { %p1217_p7 = scmp.lt.u32.totalorder %s1208_s15, %s1564_s7 }
  0x6b   : > { %p1211_p10 = pnand %p1210_p1, %p1209_p13  ;;  %p1216_p3 = por %p1215_p0, %p1214_p12 }
  0x6d   : > { %p1212_p11 = pneg %p1211_p10  ;;  %p1218_p4 = por %p1217_p7, %p1216_p3 }
  0x6f   : > { %p1219_p6 = pnand %p1218_p4, %p1212_p11 }
  0x71   : > { %1222 = shalt.err (!%p1219_p6)
}
  0x72   : > { %s1223_s9 = scalar_lea.vmem %s1559_s24, 256  ;;  %s1311_s25 = smov [#allocation8]  }
  0x73   : > { %p1224_p8 = scmp.ne.s32.totalorder %s1559_s24, %s1223_s9  ;;  %s1228_s18 = sshll.u32 %s1311_s25, 4  ;;  %s1229_s18 = int_to_ptr.vmem [resolvable:$false] %s1228_s18 }
  0x74   : > { %s1230_s21 = scalar_lea.vmem %s1229_s18, 512  ;;  %p1231_p13 = scmp.lt.s32.totalorder %s1559_s24, %s1229_s18 }
  0x75   : > { %p1226_p5 = pnand %p1224_p8, %p1210_p1  ;;  %p1232_p10 = scmp.lt.s32.totalorder %s1230_s21, %s1223_s9 }
  0x77   : > { %p1227_p9 = pneg %p1226_p5  ;;  %p1233_p12 = por %p1232_p10, %p1231_p13 }
  0x79   : > { %p1234_p0 = pnand %p1233_p12, %p1227_p9 }
  0x7b   : > { %1237 = shalt.err (!%p1234_p0)
}
  0x7c   : > { %s1312_s12 = smov 128   ;;  %s1313_s17 = smov 8  }
  0x7d   : > { %1057 = dma.hbm_to_vmem [thread:$0]  (!%p1701_p2), %s1564_s7, 256, %s1559_s24, %s1478_s11, %s1312_s12, %s1312_s12, %s1313_s17  }
  0x7e   : > { %p1702_p1 = scmp.ne.s32.totalorder %s1698_s22, 0 }
  0x7f   : > { %s210_s20 = sand.u32 (!%p1702_p1), 1, %s1298_s29   ;;  %p1703_p11 = scmp.ne.s32.totalorder (!%p1702_p1), %s1692_s13, 0 }
  0x80   : > { %208 = sbr.rel (%p1702_p1) target bundleno = 741 (0x2e5), region = 32  ;;  %s1595_s14 = sshll.u32 (!%p1702_p1), %s210_s20, 2 }
  0x81   : > { %s211_s15 = scalar_lea.sflag (!%p1702_p1), [#allocation5], %s210_s20  ;;  %s214_s0 = scalar_lea.vmem (!%p1702_p1), [#allocation4], %s1595_s14 }
  0x87   : > { %1269 = dma.done.wait (%p1703_p11), %s211_s15, 64  }
  0x88   : > { %1271 = vsyncadd (%p1703_p11), %s211_s15, 4294967232  ;;  %s219_s10 = sand.u32 1, %s1403_s5   ;;  %s223_s22 = scalar_lea.vmem [#allocation6], %s1595_s14 }
  0x89   : > { %s220_s11 = scalar_lea.sflag [#allocation7], %s219_s10 }
  0x8a   : > { %1273 = dma.done.wait (%p1703_p11), %s220_s11, 64  }
  0x8b   : > { %1275 = vsyncadd (%p1703_p11), %s220_s11, 4294967232  ;;  %s230_s24 = sand.u32 1, %s1286_s26   ;;  %p1704_p2 = scmp.ne.s32.totalorder %s1694_s16, 0 }
  0x8c   : > { %s957_s7 = sshll.u32 %s230_s24, 4 }
  0x8d   : > { %s232_s19 = scalar_lea.vmem [#allocation8], %s957_s7 }
  0x8e   : > { %1277 = dma.done.wait (%p1704_p2), %s220_s11, 256  }
  0x8f   : > { %1279 = vsyncadd (%p1704_p2), %s220_s11, 4294967040  ;;  %v1314_v0 = vmov 0.0|0.0   ;;  %vm1315_vm0 = vmmov 0   ;;  %v1316_v1 = vmov 0.0   ;;  %v273_v2 = vld [vmem:[%s232_s19] sm:$0xff]  ;;  %v274_v3 = vld [vmem:[%s232_s19 + $0x8] sm:$0xff]  ;;  %v399_v18 = vlaneseq }
  0x90   : > { %1023 = vmatprep.subr.bf16.mxu0 %v1314_v0  ;;  %992 = vmatprep.mubr.msk.f32.mxu0 %vm1315_vm0, %v1316_v1  ;;  %v1024_v4 = vpack.c.bf16 %v274_v3, %v273_v2  ;;  %v271_v5 = vld [vmem:[%s214_s0] sm:$0xf]  ;;  %vm275_vm1 = vcmask 130048   ;;  %s1317_s13 = smov 116   ;;  %s1318_s16 = smov 124   ;;  %vm820_vm2 = vcmask 1043456  }
  0x91   : > { %1026 = vmatprep.subr.bf16.mxu1 %v1314_v0  ;;  %999 = vmatprep.mubr.msk.f32.mxu1 %vm1315_vm0, %v1316_v1  ;;  %s1319_s28 = smov 112   ;;  %s1320_s8 = smov 120   ;;  %v1332_v16 = vmov 1983009808   ;;  %v400_v22 = vshrl.u32 %v399_v18, 7  ;;  %vm831_vm3 = vcmask 27648  }
  0x92   : > { %1025 = vmatpush3.bf16.msra.mxu0 %v1024_v4  ;;  %s1321_s2 = smov 104   ;;  %s1322_s9 = smov 108   ;;  %v397_v17 = vunpack.c.l.s4 %v1332_v16  ;;  %v1333_v27 = vmov 1934713408  }
  0x93   : > { %1029 = vmatprep.subr.bf16.mxu0 %v1314_v0  ;;  %s1323_s25 = smov 96   ;;  %s1324_s18 = smov 100   ;;  %v430_v28 = vunpack.c.l.s4 %v1333_v27 }
  0x94   : > { %s1325_s21 = smov 88   ;;  %s1326_s12 = smov 92   ;;  %v398_v21 = vunpack.c.0.s8 %v397_v17 }
  0x95   : > { %993 = vmatmul.mubr.msk.f32.vlgmr.msra.gmra.mrb[0].mxu0 %vm275_vm1, %v271_v5  ;;  %s1327_s17 = smov 80   ;;  %s1328_s20 = smov 84   ;;  %v431_v37 = vunpack.c.0.s8 %v430_v28 }
  0x96   : > { %1006 = vmatprep.mubr.msk.f32.mxu0 %vm1315_vm0, %v1316_v1  ;;  %s1329_s15 = smov 72   ;;  %s1330_s0 = smov 76   ;;  %v401_v26 = vsub.s32 %v398_v21, %v400_v22 }
  0x97   : > { %s1331_s10 = smov 68   ;;  %v434_v47 = vsub.s32 %v431_v37, %v400_v22  ;;  %p266_p3 = scmp.lt.s32.totalorder %s1403_s5, 15 }
  0x99   : > { %s1718_s5 = smov (!%p266_p3, %s1403_s5), 15 }
  0x9a   : > { %s970_s14 = sshll.u32 %s1718_s5, 3 }
  0x9b   : > { %s270_s24 = scalar_lea.vmem %s1684_s4, %s970_s14 }
 0x168   : > { %v1623_v6 = vpop.f32.mrb[0].mxu0 }
 0x169   : > { %356 = vrot.lane.b32.xlu1 %v1623_v6, %s1317_s13  ;;  %350 = vrot.lane.b32.xlu0 %v1623_v6, %s1318_s16  ;;  %v994_v7 = vpop.f32.mrb[1].mxu0 }
 0x16d   : > { %359 = vrot.lane.b32.xlu1 %v1623_v6, %s1319_s28  ;;  %353 = vrot.lane.b32.xlu0 %v1623_v6, %s1320_s8 }
 0x171   : > { %365 = vrot.lane.b32.xlu1 %v1623_v6, %s1321_s2  ;;  %362 = vrot.lane.b32.xlu0 %v1623_v6, %s1322_s9 }
 0x175   : > { %371 = vrot.lane.b32.xlu1 %v1623_v6, %s1323_s25  ;;  %368 = vrot.lane.b32.xlu0 %v1623_v6, %s1324_s18 }
 0x179   : > { %377 = vrot.lane.b32.xlu1 %v1623_v6, %s1325_s21  ;;  %374 = vrot.lane.b32.xlu0 %v1623_v6, %s1326_s12 }
 0x17d   : > { %383 = vrot.lane.b32.xlu1 %v1623_v6, %s1327_s17  ;;  %380 = vrot.lane.b32.xlu0 %v1623_v6, %s1328_s20 }
 0x181   : > { %389 = vrot.lane.b32.xlu1 %v1623_v6, %s1329_s15  ;;  %386 = vrot.lane.b32.xlu0 %v1623_v6, %s1330_s0 }
 0x185   : > { %392 = vrot.lane.b32.xlu0 %v1623_v6, %s1331_s10 }
 0x1db   : > { %v357_v8 = vpop.permute.xlu1 %356  ;;  %v351_v9 = vpop.permute.xlu0 %350 }
 0x1dc   : > { %v403_v32 = vcombine.low %v351_v9, %v357_v8 }
 0x1de   : > { %v410_v42 = vrot.slane %v403_v32, %v401_v26 }
 0x1df   : > { %v360_v10 = vpop.permute.xlu1 %359  ;;  %v354_v11 = vpop.permute.xlu0 %353 }
 0x1e0   : > { %v395_v29 = vcombine.low %v1623_v6, %v354_v11 }
 0x1e2   : > { %v402_v38 = vrot.slane %v395_v29, %v401_v26 }
 0x1e3   : > { %v366_v12 = vpop.permute.xlu1 %365  ;;  %v363_v13 = vpop.permute.xlu0 %362 }
 0x1e4   : > { %v411_v30 = vcombine.low %v360_v10, %v366_v12  ;;  %v427_v48 = vcombine.low %v402_v38, %v410_v42  ;;  %v428_v57 = vcombine.high %v402_v38, %v410_v42 }
 0x1e6   : > { %v418_v39 = vrot.slane %v411_v30, %v401_v26  ;;  %v435_v58 = vrot.slane %v427_v48, %v434_v47  ;;  %v442_v6 = vrot.slane %v428_v57, %v434_v47 }
 0x1e7   : > { %v372_v14 = vpop.permute.xlu1 %371  ;;  %v369_v15 = vpop.permute.xlu0 %368 }
 0x1e8   : > { %v419_v23 = vcombine.low %v363_v13, %v369_v15  ;;  %v272_v13 = vld [vmem:[%s223_s22] sm:$0xf] }
 0x1ea   : > { %v426_v33 = vrot.slane %v419_v23, %v401_v26 }
 0x1eb   : > { %v378_v19 = vpop.permute.xlu1 %377  ;;  %v375_v20 = vpop.permute.xlu0 %374 }
 0x1ec   : > { %v463_v36 = vcombine.low %v372_v14, %v378_v19  ;;  %v443_v43 = vcombine.low %v418_v39, %v426_v33  ;;  %v444_v52 = vcombine.high %v418_v39, %v426_v33 }
 0x1ee   : > { %v470_v45 = vrot.slane %v463_v36, %v401_v26  ;;  %v451_v53 = vrot.slane %v443_v43, %v434_v47  ;;  %v458_v62 = vrot.slane %v444_v52, %v434_v47 }
 0x1ef   : > { %v384_v24 = vpop.permute.xlu1 %383  ;;  %v381_v25 = vpop.permute.xlu0 %380 }
 0x1f0   : > { %v471_v31 = vcombine.low %v375_v20, %v381_v25  ;;  %v459_v63 = vcombine.low %v435_v58, %v451_v53  ;;  %v460_v3 = vcombine.high %v435_v58, %v451_v53  ;;  %v461_v11 = vcombine.low %v442_v6, %v458_v62 }
 0x1f1   : > { %v462_v12 = vcombine.high %v442_v6, %v458_v62 }
 0x1f2   : > { %v478_v40 = vrot.slane %v471_v31, %v401_v26 }
 0x1f3   : > { %v390_v34 = vpop.permute.xlu1 %389  ;;  %v387_v35 = vpop.permute.xlu0 %386 }
 0x1f4   : > { %v479_v41 = vcombine.low %v384_v24, %v390_v34  ;;  %v495_v49 = vcombine.low %v470_v45, %v478_v40  ;;  %v496_v54 = vcombine.high %v470_v45, %v478_v40 }
 0x1f6   : > { %v486_v50 = vrot.slane %v479_v41, %v401_v26  ;;  %v503_v60 = vrot.slane %v495_v49, %v434_v47  ;;  %v510_v2 = vrot.slane %v496_v54, %v434_v47 }
 0x1f7   : > { %v393_v44 = vpop.permute.xlu0 %392 }
 0x1f8   : > { %v487_v46 = vcombine.low %v387_v35, %v393_v44 }
 0x1fa   : > { %v494_v51 = vrot.slane %v487_v46, %v401_v26 }
 0x1fc   : > { %v511_v55 = vcombine.low %v486_v50, %v494_v51  ;;  %v512_v56 = vcombine.high %v486_v50, %v494_v51 }
 0x1fe   : > { %v526_v59 = vrot.slane %v512_v56, %v434_v47  ;;  %v519_v61 = vrot.slane %v511_v55, %v434_v47 }
 0x200   : > { %v527_v4 = vcombine.low %v503_v60, %v519_v61  ;;  %v528_v5 = vcombine.high %v503_v60, %v519_v61  ;;  %v529_v7 = vcombine.low %v510_v2, %v526_v59  ;;  %v530_v8 = vcombine.high %v510_v2, %v526_v59 }
 0x202   : > { %v1027_v9 = vpack.c.bf16 %v527_v4, %v459_v63  ;;  %v1030_v10 = vpack.c.bf16 %v528_v5, %v460_v3  ;;  %v1033_v14 = vpack.c.bf16 %v529_v7, %v461_v11  ;;  %v1036_v15 = vpack.c.bf16 %v530_v8, %v462_v12 }
 0x204   : > { %1028 = vmatpush3.bf16.msra.mxu1 %v1027_v9  ;;  %1031 = vmatpush3.bf16.msra.mxu0 %v1030_v10 }
 0x205   : > { %1032 = vmatprep.subr.bf16.mxu1 %v1314_v0  ;;  %1035 = vmatprep.subr.bf16.mxu0 %v1314_v0 }
 0x207   : > { %1007 = vmatmul.mubr.msk.f32.vlgmr.msra.gmra.mrb[2].mxu0 %vm275_vm1, %v272_v13  ;;  %1000 = vmatmul.mubr.msk.f32.vlgmr.msra.gmra.mrb[0].mxu1 %vm275_vm1, %v272_v13 }
 0x208   : > { %1034 = vmatpush3.bf16.msra.mxu1 %v1033_v14  ;;  %1037 = vmatpush3.bf16.msra.mxu0 %v1036_v15 }
 0x209   : > { %1020 = vmatprep.mubr.msk.f32.mxu0 %vm1315_vm0, %v1316_v1  ;;  %1013 = vmatprep.mubr.msk.f32.mxu1 %vm1315_vm0, %v1316_v1 }
 0x20b   : > { %1021 = vmatmul.mubr.msk.f32.vlgmr.msra.gmra.mrb[4].mxu0 %vm275_vm1, %v272_v13  ;;  %1014 = vmatmul.mubr.msk.f32.vlgmr.msra.gmra.mrb[2].mxu1 %vm275_vm1, %v272_v13 }
 0x2da   : > { %v670_v0 = vpop.f32.mrb[2].mxu0  ;;  %v600_v16 = vpop.f32.mrb[0].mxu1 }
 0x2db   : > { %v815_v17 = vrot.slane %v670_v0, 4  ;;  %v1008_v18 = vpop.f32.mrb[3].mxu0  ;;  %v1001_v19 = vpop.f32.mrb[1].mxu1 }
 0x2dd   : > { %v821_v20 = vsel %vm820_vm2, %v600_v16, %v815_v17 }
 0x2de   : > { %v971_v1 = vpack.c.bf16 %v821_v20, %v821_v20  ;;  %v810_v21 = vpop.f32.mrb[4].mxu0  ;;  %v740_v22 = vpop.f32.mrb[2].mxu1 }
 0x2df   : > { %v818_v23 = vrot.slane %v810_v21, 4  ;;  %v1022_v24 = vpop.f32.mrb[5].mxu0  ;;  %v1015_v25 = vpop.f32.mrb[3].mxu1 }
 0x2e0   : > { %832 = vst.msk [vmem:[%s270_s24] sm:$0xf] %vm831_vm3, %v971_v1 }
 0x2e1   : > { %v822_v26 = vsel %vm820_vm2, %v740_v22, %v818_v23 }
 0x2e2   : > { %v972_v27 = vpack.c.bf16 %v822_v26, %v822_v26 }
 0x2e4   : > { %833 = vst.msk [vmem:[%s270_s24 + $0x4] sm:$0xf] %vm831_vm3, %v972_v27 }
 0x2e5 PF: > { %s1705_s5 = sld [smem:[#allocation15_spill]]  ;;  %p21_p7 = scmp.ge.s32.totalorder %s1406_s6, 18  }
 0x2e6   : > { %s1706_s25 = smov %s1286_s26  ;;  %s1707_s26 = smov %s1290_s27 }
 0x2e7   : > { %s1708_s27 = smov %s1458_s23  ;;  %s1709_s28 = smov %s1298_s29 }
 0x2e8   : > { %s1710_s29 = smov %s1302_s30  ;;  %s1712_s0 = smov %s1406_s6 }
 0x2e9   :  { %23 = sbr.rel (!%p21_p7) target bundleno = 19 (0x13), region = 96 }
 0x2eb   : > { %s1711_s30 = smov %s1705_s5 }
 0x2f0   :  { %855 = vsyncpa [#allocation5], 1 }
 0x2f1   :  { %857 = vsyncpa [#allocation5 + $0x1], 1 }
 0x2f2   :  { %858 = vsyncpa [#allocation7], 1 }
 0x2f3   :  { %860 = vsyncpa [#allocation7 + $0x1], 1 }

</bundles_post_ra>
